<compile_context>
chip_gen: v7x
topology: tpu7x:2x2x1
jax: 0.10.0
libtpu: 0.0.40
codegen_flags: <defaults>
</compile_context>

<pallas_src>
import functools

import jax
import jax.numpy as jnp
from jax.experimental import pallas as pl
from jax.experimental.pallas import tpu as pltpu


_VMEM_LIMIT = 48 * 1024 * 1024     # fits v5e/v6e/v7x; well above scoped defaults


def _round_up(x, m):
    return ((x + m - 1) // m) * m


# ----------------------------------------------------------------------------
# Pallas kernels
# ----------------------------------------------------------------------------
def _implicit_conv_kernel(taps, relu, has_res, x_ref, w_ref, b_ref, *rest):
    """Implicit-im2col 3x3 stride-1 conv, fused bias [+ residual] [+ ReLU].

    x_ref : (1, Lin, C)   flat zero-padded activation for one batch item
    w_ref : (T, C, TN)    BN-folded weight taps (T = kh*kw)
    b_ref : (1, TN)       folded bias (f32)
    r_ref : (1, Mo, TN)   optional residual in the same wide-flat layout
    o_ref : (1, Mo, TN)   wide-flat output (Mo = Ho * Wp)
    """
    if has_res:
        r_ref, o_ref = rest
    else:
        (o_ref,) = rest
    mo, tn = o_ref.shape[1], o_ref.shape[2]
    acc = jnp.zeros((mo, tn), jnp.float32)
    for t, off in enumerate(taps):
        acc = acc + jnp.dot(x_ref[0, off:off + mo, :], w_ref[t],
                            preferred_element_type=jnp.float32)
    acc = acc + b_ref[...]
    if has_res:
        acc = acc + r_ref[0].astype(jnp.float32)
    if relu:
        acc = jnp.maximum(acc, 0.0)
    o_ref[0] = acc.astype(o_ref.dtype)


def _mm_kernel(relu, p_ref, w_ref, b_ref, o_ref):
    """Single-K-step (patches @ folded weight) + bias [+ ReLU] for strided convs."""
    acc = jnp.dot(p_ref[...], w_ref[...], preferred_element_type=jnp.float32)
    acc = acc + b_ref[...]
    if relu:
        acc = jnp.maximum(acc, 0.0)
    o_ref[...] = acc.astype(o_ref.dtype)


def _maxpool_kernel(taps, x_ref, o_ref):
    """Stride-1 'wide' 3x3 running max over the flat (-inf padded) slab."""
    mo = o_ref.shape[1]
    r = x_ref[0, taps[0]:taps[0] + mo, :]
    for off in taps[1:]:
        r = jnp.maximum(r, x_ref[0, off:off + mo, :])
    o_ref[0] = r


# ----------------------------------------------------------------------------
# Wrappers
# ----------------------------------------------------------------------------
def _conv3x3_implicit(x, p, relu=True, residual=None):
    """3x3 stride-1 pad-1 conv via implicit im2col ('wide' flat formulation)."""
    N, H, W, C = x.shape
    kh, kw = p['kh'], p['kw']
    Np = p['w'].shape[-1]
    TN = min(256, Np)
    Hp, Wp = H + 2, W + 2
    Mo = H * Wp                       # wide output rows (Ho == H for s=1, p=1)
    Lin = Hp * Wp + (kw - 1)          # flat length + tail so the last tap fits

    xp = jnp.pad(x, ((0, 0), (1, 1), (1, 1), (0, 0)))
    xflat = jnp.pad(xp.reshape(N, Hp * Wp, C), ((0, 0), (0, kw - 1), (0, 0)))
    taps = tuple(dy * Wp + dx for dy in range(kh) for dx in range(kw))

    inputs = [xflat, p['w'], p['bias']]
    in_specs = [
        pl.BlockSpec((1, Lin, C), lambda n, j: (n, 0, 0)),
        pl.BlockSpec((kh * kw, C, TN), lambda n, j: (0, 0, j)),
        pl.BlockSpec((1, TN), lambda n, j: (0, j)),
    ]
    has_res = residual is not None
    if has_res:
        r = jnp.pad(residual.astype(jnp.bfloat16),
                    ((0, 0), (0, 0), (0, Wp - W), (0, Np - residual.shape[-1])))
        inputs.append(r.reshape(N, Mo, Np))
        in_specs.append(pl.BlockSpec((1, Mo, TN), lambda n, j: (n, 0, j)))

    out = pl.pallas_call(
        functools.partial(_implicit_conv_kernel, taps, relu, has_res),
        grid=(N, Np // TN),
        in_specs=in_specs,
        out_specs=pl.BlockSpec((1, Mo, TN), lambda n, j: (n, 0, j)),
        out_shape=jax.ShapeDtypeStruct((N, Mo, Np), jnp.bfloat16),
        compiler_params=pltpu.CompilerParams(
            dimension_semantics=("parallel", "parallel"),
            vmem_limit_bytes=_VMEM_LIMIT),
    )(*inputs)
    # drop the kw-1 wrap columns and the padded channels
    return out.reshape(N, H, Wp, Np)[:, :, :W, :p['cout']]


def _extract_patches(x, kh, kw, stride, pad):
    """x: (N,H,W,C) NHWC -> patches (N*Ho*Wo, kh*kw*C), tap-major then channel."""
    if pad > 0:
        x = jnp.pad(x, ((0, 0), (pad, pad), (pad, pad), (0, 0)))
    N, Hp, Wp, C = x.shape
    Ho = (Hp - kh) // stride + 1
    Wo = (Wp - kw) // stride + 1
    cols = []
    for i in range(kh):
        for j in range(kw):
            sl = jax.lax.slice(
                x, (0, i, j, 0),
                (N, i + stride * (Ho - 1) + 1, j + stride * (Wo - 1) + 1, C),
                (1, stride, stride, 1))
            cols.append(sl)
    patches = jnp.stack(cols, axis=3).reshape(N * Ho * Wo, kh * kw * C)
    return patches, (N, Ho, Wo)


def _conv_im2col(x, p, stride, pad, relu):
    """Strided convs: explicit im2col feeding the fused single-K-step kernel."""
    patches, (N, Ho, Wo) = _extract_patches(x, p['kh'], p['kw'], stride, pad)
    M, K = patches.shape
    Np = p['w'].shape[-1]
    w2 = p['w'].reshape(K, Np)                  # contiguous, no copy
    TN = min(256, Np)
    if M % 256 == 0:
        TM, Mp = 256, M
    elif M <= 1024:
        TM, Mp = M, M                           # full extent, no padding copy
    else:
        TM, Mp = 256, _round_up(M, 256)
    if Mp != M:
        patches = jnp.pad(patches, ((0, Mp - M), (0, 0)))

    out = pl.pallas_call(
        functools.partial(_mm_kernel, relu),
        grid=(Mp // TM, Np // TN),
        in_specs=[pl.BlockSpec((TM, K), lambda i, j: (i, 0)),
                  pl.BlockSpec((K, TN), lambda i, j: (0, j)),   # weight resident
                  pl.BlockSpec((1, TN), lambda i, j: (0, j))],
        out_specs=pl.BlockSpec((TM, TN), lambda i, j: (i, j)),
        out_shape=jax.ShapeDtypeStruct((Mp, Np), jnp.bfloat16),
        compiler_params=pltpu.CompilerParams(
            dimension_semantics=("parallel", "parallel"),
            vmem_limit_bytes=_VMEM_LIMIT),
    )(patches, w2, p['bias'])
    return out[:M].reshape(N, Ho, Wo, Np)[..., :p['cout']]


def _maxpool2d_pallas(x, k=3, stride=2, pad=1):
    """MaxPool2d(3,2,1): stride-1 wide max in Pallas + strided subsample."""
    N, H, W, C = x.shape
    Hp, Wp = H + 2 * pad, W + 2 * pad
    Ho = (Hp - k) // stride + 1
    Wo = (Wp - k) // stride + 1
    Hv = Hp - k + 1                         # stride-1 valid rows
    Mo = Hv * Wp                            # wide flat output rows
    Lin = Hp * Wp + (k - 1)

    xp = jnp.pad(x, ((0, 0), (pad, pad), (pad, pad), (0, 0)),
                 constant_values=-jnp.inf)
    xflat = jnp.pad(xp.reshape(N, Hp * Wp, C), ((0, 0), (0, k - 1), (0, 0)),
                    constant_values=-jnp.inf)
    taps = tuple(dy * Wp + dx for dy in range(k) for dx in range(k))

    out = pl.pallas_call(
        functools.partial(_maxpool_kernel, taps),
        grid=(N,),
        in_specs=[pl.BlockSpec((1, Lin, C), lambda n: (n, 0, 0))],
        out_specs=pl.BlockSpec((1, Mo, C), lambda n: (n, 0, 0)),
        out_shape=jax.ShapeDtypeStruct((N, Mo, C), x.dtype),
        compiler_params=pltpu.CompilerParams(
            dimension_semantics=("parallel",),
            vmem_limit_bytes=_VMEM_LIMIT),
    )(xflat)
    wide = out.reshape(N, Hv, Wp, C)
    return jax.lax.slice(wide, (0, 0, 0, 0),
                         (N, stride * (Ho - 1) + 1, stride * (Wo - 1) + 1, C),
                         (1, stride, stride, 1))


# ----------------------------------------------------------------------------
# ResNet-34 parameters (deterministic init; BN folded + padded + bf16 at init)
# ----------------------------------------------------------------------------
def _make_cbn(key, kh, kw, cin, cout):
    k1, k2, k3 = jax.random.split(key, 3)
    fan_in = kh * kw * cin
    w = jax.random.normal(k1, (kh * kw, cin, cout), jnp.float32) * (2.0 / fan_in) ** 0.5
    gamma = 1.0 + 0.05 * jax.random.normal(k2, (cout,), jnp.float32)
    beta = 0.05 * jax.random.normal(k3, (cout,), jnp.float32)
    # eval-mode BN (running_mean=0, running_var=1, eps=1e-5) folded into weight
    scale = gamma / jnp.sqrt(1.0 + 1e-5)
    w = w * scale[None, None, :]
    np_ = _round_up(cout, 128)                              # lane-dense Cout
    w = jnp.pad(w, ((0, 0), (0, 0), (0, np_ - cout))).astype(jnp.bfloat16)
    b = jnp.pad(beta, (0, np_ - cout)).reshape(1, np_).astype(jnp.float32)
    return {'w': w, 'bias': b, 'kh': kh, 'kw': kw, 'cout': cout}


def init_params(key, in_channels=6):
    keys = iter(jax.random.split(key, 64))
    params = {'conv1': _make_cbn(next(keys), 7, 7, in_channels, 64)}
    cfg = [('layer1', 64, 64, 3, 1), ('layer2', 64, 128, 4, 2),
           ('layer3', 128, 256, 6, 2), ('layer4', 256, 512, 3, 2)]
    for name, cin, cout, nblk, stride in cfg:
        blocks = []
        for b in range(nblk):
            s = stride if b == 0 else 1
            c_in = cin if b == 0 else cout
            blk = {'conv1': _make_cbn(next(keys), 3, 3, c_in, cout),
                   'conv2': _make_cbn(next(keys), 3, 3, cout, cout),
                   'stride': s}
            if s != 1 or c_in != cout:
                blk['down'] = _make_cbn(next(keys), 1, 1, c_in, cout)
            blocks.append(blk)
        params[name] = blocks
    return params


# ----------------------------------------------------------------------------
# Forward pass (matches LidarBEVBackbone.forward)
# ----------------------------------------------------------------------------
def _basic_block(x, blk):
    s = blk['stride']
    if 'down' in blk:
        identity = _conv_im2col(x, blk['down'], stride=s, pad=0, relu=False)
    else:
        identity = x
    if s == 1:
        out = _conv3x3_implicit(x, blk['conv1'], relu=True)
    else:
        out = _conv_im2col(x, blk['conv1'], stride=s, pad=1, relu=True)
    # conv2 + BN + residual add + ReLU fused in one implicit-im2col kernel
    out = _conv3x3_implicit(out, blk['conv2'], relu=True, residual=identity)
    return out


def lidar_bev_backbone_forward(params, x_nchw):
    # NCHW -> NHWC, bf16 activations between layers (MXU-friendly, half the DMA)
    x = jnp.transpose(x_nchw, (0, 2, 3, 1)).astype(jnp.bfloat16)
    # layer0: conv1(7x7,s2,p3) + BN + ReLU + maxpool(3,2,1)
    x = _conv_im2col(x, params['conv1'], stride=2, pad=3, relu=True)
    x0 = _maxpool2d_pallas(x, k=3, stride=2, pad=1)
    feats = [x0]
    x = x0
    for name in ('layer1', 'layer2', 'layer3', 'layer4'):
        for blk in params[name]:
            x = _basic_block(x, blk)
        feats.append(x)
    # back to NCHW / f32 to mirror the PyTorch output convention
    # TODO(synk): keep NHWC bf16 if the downstream consumer allows it.
    features = [jnp.transpose(f, (0, 3, 1, 2)).astype(jnp.float32) for f in feats]
    return features, features[-1]


# ----------------------------------------------------------------------------
if __name__ == "__main__":
    key = jax.random.PRNGKey(0)
    k_in, k_par = jax.random.split(key)

    N, C, H, W = 2, 6, 16, 16
    x = jax.random.normal(k_in, (N, C, H, W), jnp.float32)

    params = init_params(k_par, in_channels=C)
    features, x4 = lidar_bev_backbone_forward(params, x)
    jax.block_until_ready(x4)
    for f in features:
        jax.block_until_ready(f)

    expected = [(N, 64, 4, 4), (N, 64, 4, 4), (N, 128, 2, 2),
                (N, 256, 1, 1), (N, 512, 1, 1)]
    assert [tuple(f.shape) for f in features] == expected, \
        [tuple(f.shape) for f in features]
    assert tuple(x4.shape) == (N, 512, 1, 1)
    assert bool(jnp.all(jnp.isfinite(x4)))

    print("KERNEL_OK")
</pallas_src>

<mosaic_0001>
module attributes {stable_mosaic.version = 11 : i64} {
  func.func @_mm_kernel(%arg0: i32, %arg1: i32, %arg2: memref<128x294xbf16, #tpu.memory_space<vmem>>, %arg3: memref<294x128xbf16, #tpu.memory_space<vmem>>, %arg4: memref<1x128xf32, #tpu.memory_space<vmem>>, %arg5: memref<128x128xbf16, #tpu.memory_space<vmem>>) attributes {dimension_semantics = [#tpu.dimension_semantics<parallel>, #tpu.dimension_semantics<parallel>], iteration_bounds = array<i64: 1, 1>, scalar_prefetch = 0 : i64, scratch_operands = 0 : i64, tpu.core_type = #tpu.core_type<tc>, window_params = [{transform_indices = @transform_0, window_bounds = array<i64: 128, 294>}, {transform_indices = @transform_1, window_bounds = array<i64: 294, 128>}, {transform_indices = @transform_2, window_bounds = array<i64: 1, 128>}, {transform_indices = @transform_3, window_bounds = array<i64: 128, 128>}]} {
    %c0 = arith.constant 0 : index
    %c0_0 = arith.constant 0 : index
    %0 = vector.load %arg2[%c0, %c0_0] : memref<128x294xbf16, #tpu.memory_space<vmem>>, vector<128x294xbf16>
    %c0_1 = arith.constant 0 : index
    %c0_2 = arith.constant 0 : index
    %1 = vector.load %arg3[%c0_1, %c0_2] : memref<294x128xbf16, #tpu.memory_space<vmem>>, vector<294x128xbf16>
    %cst = arith.constant dense<0.000000e+00> : vector<128x128xf32>
    %2 = tpu.matmul %0, %1, %cst {dimension_numbers = #tpu.dot_dimension_numbers<[1], [0], [0], [1], [0, 0, 1, 1], [], []>} : vector<128x294xbf16>, vector<294x128xbf16>, vector<128x128xf32> -> vector<128x128xf32>
    %c0_3 = arith.constant 0 : index
    %c0_4 = arith.constant 0 : index
    %3 = vector.load %arg4[%c0_3, %c0_4] : memref<1x128xf32, #tpu.memory_space<vmem>>, vector<1x128xf32>
    %4 = vector.broadcast %3 : vector<1x128xf32> to vector<128x128xf32>
    %5 = arith.addf %2, %4 : vector<128x128xf32>
    %cst_5 = arith.constant 0.000000e+00 : f32
    %6 = vector.broadcast %cst_5 : f32 to vector<128x128xf32>
    %7 = arith.maximumf %5, %6 : vector<128x128xf32>
    %8 = arith.truncf %7 : vector<128x128xf32> to vector<128x128xbf16>
    %c0_6 = arith.constant 0 : index
    %c0_7 = arith.constant 0 : index
    %9 = vector.load %arg5[%c0_6, %c0_7] : memref<128x128xbf16, #tpu.memory_space<vmem>>, vector<128x128xbf16>
    tpu.vector_store %arg5[%c0_6, %c0_7], %8 {strides = array<i32>} : memref<128x128xbf16, #tpu.memory_space<vmem>>, vector<128x128xbf16>,
    return
  }
  func.func @transform_0(%arg0: i32, %arg1: i32) -> (i32, i32) {
    %c0_i32 = arith.constant 0 : i32
    %c0_i32_0 = arith.constant 0 : i32
    return %arg0, %c0_i32 : i32, i32
  }
  func.func @transform_1(%arg0: i32, %arg1: i32) -> (i32, i32) {
    %c0_i32 = arith.constant 0 : i32
    %c0_i32_0 = arith.constant 0 : i32
    return %c0_i32, %arg1 : i32, i32
  }
  func.func @transform_2(%arg0: i32, %arg1: i32) -> (i32, i32) {
    %c0_i32 = arith.constant 0 : i32
    %c0_i32_0 = arith.constant 0 : i32
    return %c0_i32, %arg1 : i32, i32
  }
  func.func @transform_3(%arg0: i32, %arg1: i32) -> (i32, i32) {
    %c0_i32 = arith.constant 0 : i32
    return %arg0, %arg1 : i32, i32
  }
}

</mosaic_0001>

<bundles_post_ra>
// kernel: tpu_custom_call.1
= control target key start
LH: loop header
LB: loop body
LE: loop exit
PB: predicated region body
PF: predicated region fallthrough
CT: control target
= control target key end

     0   :  { %vm348_vm0 = vcmask 1042432   ;;  %s1186_s0 = inlined_call_operand.vmem [shape: bf16[128,294], index: 0, kind: input, shape index: {}]   ;;  %s1187_s1 = inlined_call_operand.vmem [shape: bf16[294,128], index: 1, kind: input, shape index: {}]   ;;  %s1188_s2 = inlined_call_operand.vmem [shape: f32[1,128], index: 2, kind: input, shape index: {}]   ;;  %s1189_s3 = inlined_call_operand.hbm [shape: bf16[128,128], index: 3, kind: output, shape index: {}]  }
   0x1   :  { %v906_v0 = vld [vmem:[%s1187_s1 + $0x40] sm:$0xff]   ;;  %v908_v2 = vld [vmem:[%s1187_s1 + $0x48] sm:$0xff]   ;;  %v910_v4 = vld [vmem:[%s1187_s1 + $0x50] sm:$0xff]  }
   0x2   :  { %v907_v1 = vld [vmem:[%s1187_s1] sm:$0xff]   ;;  %789 = vmatprep.subr.bf16.mxu0 %v906_v0  ;;  %886 = vmatprep.subr.bf16.mxu1 %v906_v0  ;;  %v909_v3 = vld [vmem:[%s1187_s1 + $0x8] sm:$0xff]   ;;  %v911_v5 = vld [vmem:[%s1187_s1 + $0x10] sm:$0xff]  }
   0x3   :  { %790 = vmatpush3.bf16.msra.mxu0 %v907_v1  ;;  %894 = vmatpush3.bf16.msra.mxu1 %v907_v1  ;;  %v912_v6 = vld [vmem:[%s1187_s1 + $0x58] sm:$0xff]   ;;  %v914_v8 = vld [vmem:[%s1187_s1 + $0x60] sm:$0xff]   ;;  %v916_v10 = vld [vmem:[%s1187_s1 + $0x68] sm:$0xff]  }
   0x4   :  { %791 = vmatprep.subr.bf16.mxu0 %v908_v2  ;;  %887 = vmatprep.subr.bf16.mxu1 %v908_v2  ;;  %v913_v7 = vld [vmem:[%s1187_s1 + $0x18] sm:$0xff]   ;;  %v915_v9 = vld [vmem:[%s1187_s1 + $0x20] sm:$0xff]   ;;  %v917_v13 = vld [vmem:[%s1187_s1 + $0x28] sm:$0xff]  }
   0x5   :  { %v924_v11 = vld [vmem:[%s1186_s0 + $0x4] ss:$12 sps:$4 sm:$0xff]   ;;  %v927_v12 = vld [vmem:[%s1186_s0 + $0x94] ss:$12 sps:$4 sm:$0xff]   ;;  %v920_v16 = vld [vmem:[%s1187_s1 + $0x78] sm:$0xff]  }
   0x6   :  { %v918_v14 = vld [vmem:[%s1187_s1 + $0x70] sm:$0xff]   ;;  %384 = vmatprep.mubr.bf16.mxu0 %v924_v11  ;;  %432 = vmatprep.mubr.bf16.mxu1 %v927_v12  ;;  %v921_v17 = vld [vmem:[%s1187_s1 + $0x38] sm:$0xff]   ;;  %v928_v18 = vld [vmem:[%s1187_s1 + $0x80] sm:$0xff]  }
   0x7   :  { %792 = vmatpush3.bf16.msra.mxu0 %v909_v3  ;;  %895 = vmatpush3.bf16.msra.mxu1 %v909_v3  ;;  %v919_v15 = vld [vmem:[%s1187_s1 + $0x30] sm:$0xff]   ;;  %v922_v19 = vld [vmem:[%s1186_s0] ss:$12 sps:$4 sm:$0xff]   ;;  %v929_v21 = vld [vmem:[%s1186_s0 + $0x1c] ss:$12 sps:$4 sm:$0xff]  }
   0x8   :  { %793 = vmatprep.subr.bf16.mxu0 %v910_v4  ;;  %888 = vmatprep.subr.bf16.mxu1 %v910_v4  ;;  %v925_v20 = vld [vmem:[%s1186_s0 + $0x90] ss:$12 sps:$4 sm:$0xff]   ;;  %v931_v22 = vld [vmem:[%s1186_s0 + $0xac] ss:$12 sps:$4 sm:$0xff]  }
   0x9   :  { %v935_v23 = vld [vmem:[%s1187_s1 + $0x88] sm:$0xff]   ;;  %v936_v24 = vld [vmem:[%s1187_s1 + $0x90] ss:$0 sps:$4 sm:$0x77]  }
   0xb   :  { %794 = vmatpush3.bf16.msra.mxu0 %v911_v5  ;;  %896 = vmatpush3.bf16.msra.mxu1 %v911_v5 }
   0xc   :  { %795 = vmatprep.subr.bf16.mxu0 %v912_v6  ;;  %889 = vmatprep.subr.bf16.mxu1 %v912_v6 }
   0xf   :  { %796 = vmatpush3.bf16.msra.mxu0 %v913_v7  ;;  %897 = vmatpush3.bf16.msra.mxu1 %v913_v7 }
  0x10   :  { %797 = vmatprep.subr.bf16.mxu0 %v914_v8  ;;  %890 = vmatprep.subr.bf16.mxu1 %v914_v8 }
  0x13   :  { %798 = vmatpush3.bf16.msra.mxu0 %v915_v9  ;;  %898 = vmatpush3.bf16.msra.mxu1 %v915_v9 }
  0x14   :  { %799 = vmatprep.subr.bf16.mxu0 %v916_v10  ;;  %891 = vmatprep.subr.bf16.mxu1 %v916_v10 }
  0x17   :  { %800 = vmatpush3.bf16.msra.mxu0 %v917_v13  ;;  %899 = vmatpush3.bf16.msra.mxu1 %v917_v13 }
  0x18   :  { %801 = vmatprep.subr.bf16.mxu0 %v918_v14  ;;  %892 = vmatprep.subr.bf16.mxu1 %v918_v14 }
  0x1b   :  { %802 = vmatpush3.bf16.msra.mxu0 %v919_v15  ;;  %900 = vmatpush3.bf16.msra.mxu1 %v919_v15 }
  0x1c   :  { %803 = vmatprep.subr.bf16.mxu0 %v920_v16  ;;  %893 = vmatprep.subr.bf16.mxu1 %v920_v16 }
  0x1f   :  { %804 = vmatpush3.bf16.msra.mxu0 %v921_v17  ;;  %901 = vmatpush3.bf16.msra.mxu1 %v921_v17 }
  0x20   :  { %864 = vmatprep.subr.bf16.mxu1 %v928_v18 }
  0x22   :  { %385 = vmatmul.mubr.bf16.vlgmr.msra.gmra.mrb[0].mxu0 %v922_v19  ;;  %433 = vmatmul.mubr.bf16.vlgmr.msra.gmra.mrb[0].mxu1 %v925_v20 }
  0x23   :  { %865 = vmatpush3.bf16.msra.mxu1 %v928_v18  ;;  %392 = vmatprep.mubr.bf16.mxu0 %v929_v21 }
  0x24   :  { %440 = vmatprep.mubr.bf16.mxu1 %v931_v22  ;;  %866 = vmatprep.subr.bf16.mxu1 %v935_v23 }
  0x25   :  { %8 = vsyncpa [#allocation3], 0  ;;  %v933_v25 = vld [vmem:[%s1186_s0 + $0x18] ss:$12 sps:$4 sm:$0xff]   ;;  %v934_v26 = vld [vmem:[%s1186_s0 + $0xa8] ss:$12 sps:$4 sm:$0xff]  }
  0x26   :  { %v937_v27 = vld [vmem:[%s1186_s0 + $0x34] ss:$12 sps:$4 sm:$0xff]   ;;  %v350_v28 = vsel %vm348_vm0, %v936_v24, 0  ;;  %vm323_vm1 = vcmask 310272   ;;  %v940_v30 = vld [vmem:[%s1186_s0 + $0x30] ss:$12 sps:$4 sm:$0xff]  }
  0x27   :  { %867 = vmatpush3.bf16.msra.mxu1 %v935_v23  ;;  %v939_v29 = vld [vmem:[%s1186_s0 + $0x8] ss:$12 sps:$4 sm:$0xff]   ;;  %v941_v31 = vld [vmem:[%s1186_s0 + $0x20] ss:$12 sps:$4 sm:$0xff]   ;;  %v944_v33 = vld [vmem:[%s1186_s0 + $0x38] ss:$12 sps:$4 sm:$0xff]  }
  0x28   :  { %902 = vmatprep.subr.msk.bf16.mxu1 %vm348_vm0, %v936_v24  ;;  %v942_v32 = vld [vmem:[%s1186_s0 + $0x4c] ss:$12 sps:$4 sm:$0xff]   ;;  %v945_v34 = vld [vmem:[%s1186_s0 + $0x48] ss:$12 sps:$4 sm:$0xff]   ;;  %v946_v35 = vld [vmem:[%s1186_s0 + $0x50] ss:$12 sps:$4 sm:$0xff]  }
  0x29   :  { %v947_v36 = vld [vmem:[%s1186_s0 + $0x64] ss:$12 sps:$4 sm:$0xff]   ;;  %v949_v37 = vld [vmem:[%s1186_s0 + $0x68] ss:$12 sps:$4 sm:$0xff]   ;;  %v950_v38 = vld [vmem:[%s1186_s0 + $0x60] ss:$12 sps:$4 sm:$0xff]  }
  0x2a   :  { %393 = vmatmul.mubr.bf16.gmra.mrb[4].mxu0 %v933_v25  ;;  %441 = vmatmul.mubr.bf16.gmra.mrb[4].mxu1 %v934_v26  ;;  %v951_v39 = vld [vmem:[%s1186_s0 + $0x80] ss:$12 sps:$4 sm:$0xff]   ;;  %v952_v40 = vld [vmem:[%s1186_s0 + $0x7c] ss:$12 sps:$4 sm:$0xff]   ;;  %v954_v41 = vld [vmem:[%s1186_s0 + $0x98] ss:$12 sps:$4 sm:$0xff]  }
  0x2b   :  { %869 = vmatpush3.bf16.msra.mxu1 %v350_v28  ;;  %400 = vmatprep.mubr.bf16.mxu0 %v937_v27  ;;  %v955_v42 = vld [vmem:[%s1186_s0 + $0x78] ss:$12 sps:$4 sm:$0xff]   ;;  %v956_v43 = vld [vmem:[%s1186_s0 + $0xb0] ss:$12 sps:$4 sm:$0xff]   ;;  %v1152_v4 = vld [vmem:[%s1188_s2] ss:$0 sm:$0xff] }
  0x2c   :  { %870 = vmatprep.mubr.msk.bf16.mxu1 %vm323_vm1, %v939_v29  ;;  %s981_s2 = smov [#allocation2]  }
  0x2d   :  { %s647_s16 = sshll.u32 %s981_s2, 4  ;;  %s648_s16 = int_to_ptr.vmem [resolvable:$true] %s647_s16 }
  0x2e   :  { %s957_s17 = scalar_lea.vmem %s648_s16, 1024  ;;  %p962_p1 = scmp.lt.s32.totalorder %s648_s16, %s648_s16 }
  0x2f   :  { %p958_p0 = scmp.ne.s32.totalorder %s648_s16, %s957_s17  ;;  %p963_p2 = scmp.lt.s32.totalorder %s957_s17, %s957_s17 }
  0x31   :  { %p964_p3 = por %p963_p2, %p962_p1 }
  0x32   :  { %401 = vmatmul.mubr.bf16.gmra.mrb[8].mxu0 %v940_v30  ;;  %871 = vmatmul.mubr.msk.bf16.vlgmr.msra.gmra.mrb[8].mxu1 %vm323_vm1, %v941_v31 }
  0x33   :  { %408 = vmatprep.mubr.bf16.mxu0 %v942_v32  ;;  %874 = vmatprep.mubr.msk.bf16.mxu1 %vm323_vm1, %v944_v33  ;;  %p965_p4 = pnand %p964_p3, %p958_p0 }
  0x3a   :  { %409 = vmatmul.mubr.bf16.gmra.mrb[12].mxu0 %v945_v34  ;;  %875 = vmatmul.mubr.msk.bf16.gmra.mrb[12].mxu1 %vm323_vm1, %v946_v35 }
  0x3b   :  { %416 = vmatprep.mubr.bf16.mxu0 %v947_v36  ;;  %878 = vmatprep.mubr.msk.bf16.mxu1 %vm323_vm1, %v949_v37 }
  0x42   :  { %417 = vmatmul.mubr.bf16.gmra.mrb[16].mxu0 %v950_v38  ;;  %879 = vmatmul.mubr.msk.bf16.gmra.mrb[16].mxu1 %vm323_vm1, %v951_v39 }
  0x43   :  { %424 = vmatprep.mubr.bf16.mxu0 %v952_v40  ;;  %882 = vmatprep.mubr.msk.bf16.mxu1 %vm323_vm1, %v954_v41 }
  0x4a   :  { %425 = vmatmul.mubr.bf16.gmra.mrb[20].mxu0 %v955_v42  ;;  %883 = vmatmul.mubr.msk.bf16.gmra.mrb[20].mxu1 %vm323_vm1, %v956_v43 }
  0xf5   :  { %v805_v44 = vpop.f32.mrb[0].mxu0  ;;  %v841_v45 = vpop.f32.mrb[0].mxu1 }
  0xf6   :  { %v806_v46 = vpop.f32.mrb[1].mxu0  ;;  %v842_v47 = vpop.f32.mrb[1].mxu1 }
  0xf7   :  { %v807_v48 = vadd.f32 %v806_v46, %v805_v44  ;;  %v808_v49 = vpop.f32.mrb[2].mxu0  ;;  %v1141_v50 = vadd.f32 %v842_v47, %v841_v45  ;;  %v844_v51 = vpop.f32.mrb[2].mxu1 }
  0xf8   :  { %v809_v52 = vpop.f32.mrb[3].mxu0  ;;  %v845_v53 = vpop.f32.mrb[3].mxu1 }
  0xf9   :  { %v810_v54 = vadd.f32 %v809_v52, %v808_v49  ;;  %v1143_v55 = vadd.f32 %v845_v53, %v844_v51  ;;  %v387_v8 = vadd.f32 %v807_v48, %v1152_v4 }
  0xfb   :  { %v390_v17 = vadd.f32 %v810_v54, %v1152_v4 }
  0xfd   :  { %v811_v56 = vpop.f32.mrb[4].mxu0  ;;  %v847_v57 = vpop.f32.mrb[4].mxu1 }
  0xfe   :  { %v812_v58 = vpop.f32.mrb[5].mxu0  ;;  %v848_v59 = vpop.f32.mrb[5].mxu1 }
  0xff   :  { %v813_v60 = vadd.f32 %v812_v58, %v811_v56  ;;  %v814_v61 = vpop.f32.mrb[6].mxu0  ;;  %v1145_v62 = vadd.f32 %v848_v59, %v847_v57  ;;  %v850_v63 = vpop.f32.mrb[6].mxu1 }
 0x100   :  { %v815_v0 = vpop.f32.mrb[7].mxu0  ;;  %v851_v1 = vpop.f32.mrb[7].mxu1 }
 0x101   :  { %v816_v2 = vadd.f32 %v815_v0, %v814_v61  ;;  %v1147_v3 = vadd.f32 %v851_v1, %v850_v63  ;;  %v395_v5 = vadd.f32 %v813_v60, %v1152_v4 }
 0x103   :  { %v398_v12 = vadd.f32 %v816_v2, %v1152_v4 }
 0x105   :  { %v817_v6 = vpop.f32.mrb[8].mxu0  ;;  %v872_v7 = vpop.f32.mrb[8].mxu1 }
 0x106   :  { %v492_v9 = vadd.f32 %v872_v7, %v395_v5  ;;  %v818_v10 = vpop.f32.mrb[9].mxu0  ;;  %v483_v11 = vpop.f32.mrb[9].mxu1  ;;  %v443_v7 = vadd.f32 %v1145_v62, %v1152_v4 }
 0x107   :  { %v819_v13 = vadd.f32 %v818_v10, %v817_v6  ;;  %v484_v14 = vadd.f32 %v483_v11, %v387_v8  ;;  %v820_v15 = vpop.f32.mrb[10].mxu0  ;;  %v873_v16 = vpop.f32.mrb[10].mxu1  ;;  %v435_v11 = vadd.f32 %v1141_v50, %v1152_v4 }
 0x108   :  { %v495_v18 = vadd.f32 %v873_v16, %v398_v12  ;;  %v821_v19 = vpop.f32.mrb[11].mxu0  ;;  %v486_v20 = vpop.f32.mrb[11].mxu1  ;;  %v548_v23 = vmax.f32 %v492_v9, 0.0 }
 0x109   :  { %v822_v21 = vadd.f32 %v821_v19, %v820_v15  ;;  %v487_v22 = vadd.f32 %v486_v20, %v390_v17  ;;  %v546_v25 = vmax.f32 %v484_v14, 0.0  ;;  %v403_v31 = vadd.f32 %v819_v13, %v1152_v4 }
 0x10a   :  { %v549_v24 = vmax.f32 %v495_v18, 0.0  ;;  %v446_v15 = vadd.f32 %v1147_v3, %v1152_v4 }
 0x10b   :  { %v547_v26 = vmax.f32 %v487_v22, 0.0  ;;  %v406_v38 = vadd.f32 %v822_v21, %v1152_v4 }
 0x10c   :  { %v750_v27 = vpack.c.bf16 %v549_v24, %v548_v23  ;;  %v438_v23 = vadd.f32 %v1143_v55, %v1152_v4 }
 0x10d   :  { %v745_v28 = vpack.c.bf16 %v547_v26, %v546_v25  ;;  %v823_v29 = vpop.f32.mrb[12].mxu0  ;;  %v876_v30 = vpop.f32.mrb[12].mxu1 }
 0x10e   :  { %782 = vst [vmem:[#allocation2 + $0x8] sm:$0xff] %v750_v27   ;;  %v824_v32 = vpop.f32.mrb[13].mxu0  ;;  %v499_v33 = vpop.f32.mrb[13].mxu1 }
 0x10f   :  { %746 = vst [vmem:[#allocation2] sm:$0xff] %v745_v28   ;;  %v825_v34 = vadd.f32 %v824_v32, %v823_v29  ;;  %v500_v35 = vadd.f32 %v499_v33, %v403_v31  ;;  %v826_v36 = vpop.f32.mrb[14].mxu0  ;;  %v877_v37 = vpop.f32.mrb[14].mxu1 }
 0x110   :  { %v827_v39 = vpop.f32.mrb[15].mxu0  ;;  %v502_v40 = vpop.f32.mrb[15].mxu1 }
 0x111   :  { %v411_v41 = vadd.f32 %v825_v34, %v1152_v4  ;;  %v828_v42 = vadd.f32 %v827_v39, %v826_v36  ;;  %v503_v43 = vadd.f32 %v502_v40, %v406_v38  ;;  %v550_v45 = vmax.f32 %v500_v35, 0.0 }
 0x113   :  { %v508_v44 = vadd.f32 %v876_v30, %v411_v41  ;;  %v414_v46 = vadd.f32 %v828_v42, %v1152_v4  ;;  %v551_v47 = vmax.f32 %v503_v43, 0.0 }
 0x115   :  { %v511_v48 = vadd.f32 %v877_v37, %v414_v46  ;;  %v755_v49 = vpack.c.bf16 %v551_v47, %v550_v45  ;;  %v829_v51 = vpop.f32.mrb[16].mxu0  ;;  %v880_v52 = vpop.f32.mrb[16].mxu1  ;;  %v552_v56 = vmax.f32 %v508_v44, 0.0 }
 0x116   :  { %v830_v53 = vpop.f32.mrb[17].mxu0  ;;  %v515_v54 = vpop.f32.mrb[17].mxu1 }
 0x117   :  { %v553_v57 = vmax.f32 %v511_v48, 0.0  ;;  %783 = vst [vmem:[#allocation2 + $0x10] sm:$0xff] %v755_v49   ;;  %v831_v58 = vadd.f32 %v830_v53, %v829_v51  ;;  %v832_v59 = vpop.f32.mrb[18].mxu0  ;;  %v881_v60 = vpop.f32.mrb[18].mxu1 }
 0x118   :  { %v833_v61 = vpop.f32.mrb[19].mxu0  ;;  %v518_v63 = vpop.f32.mrb[19].mxu1 }
 0x119   :  { %v760_v0 = vpack.c.bf16 %v553_v57, %v552_v56  ;;  %v419_v1 = vadd.f32 %v831_v58, %v1152_v4  ;;  %v834_v2 = vadd.f32 %v833_v61, %v832_v59 }
 0x11b   :  { %784 = vst [vmem:[#allocation2 + $0x18] sm:$0xff] %v760_v0   ;;  %v516_v5 = vadd.f32 %v515_v54, %v419_v1  ;;  %v422_v6 = vadd.f32 %v834_v2, %v1152_v4 }
 0x11d   :  { %v519_v8 = vadd.f32 %v518_v63, %v422_v6  ;;  %v835_v9 = vpop.f32.mrb[20].mxu0  ;;  %v884_v10 = vpop.f32.mrb[20].mxu1  ;;  %v554_v16 = vmax.f32 %v516_v5, 0.0 }
 0x11e   :  { %v540_v12 = vadd.f32 %v884_v10, %v443_v7  ;;  %v836_v13 = vpop.f32.mrb[21].mxu0  ;;  %v531_v14 = vpop.f32.mrb[21].mxu1 }
 0x11f   :  { %v555_v17 = vmax.f32 %v519_v8, 0.0  ;;  %v837_v18 = vadd.f32 %v836_v13, %v835_v9  ;;  %v532_v19 = vadd.f32 %v531_v14, %v435_v11  ;;  %v838_v20 = vpop.f32.mrb[22].mxu0  ;;  %v885_v21 = vpop.f32.mrb[22].mxu1 }
 0x120   :  { %v543_v22 = vadd.f32 %v885_v21, %v446_v15  ;;  %v839_v62 = vpop.f32.mrb[23].mxu0  ;;  %v534_v24 = vpop.f32.mrb[23].mxu1  ;;  %v560_v27 = vmax.f32 %v540_v12, 0.0 }
 0x121   :  { %v765_v25 = vpack.c.bf16 %v555_v17, %v554_v16  ;;  %v427_v50 = vadd.f32 %v837_v18, %v1152_v4  ;;  %v840_v26 = vadd.f32 %v839_v62, %v838_v20  ;;  %v535_v29 = vadd.f32 %v534_v24, %v438_v23 }
 0x122   :  { %v561_v28 = vmax.f32 %v543_v22, 0.0  ;;  %v558_v31 = vmax.f32 %v532_v19, 0.0 }
 0x123   :  { %785 = vst [vmem:[#allocation2 + $0x20] sm:$0xff] %v765_v25   ;;  %v524_v3 = vadd.f32 %v880_v52, %v427_v50  ;;  %v430_v30 = vadd.f32 %v840_v26, %v1152_v4  ;;  %v559_v33 = vmax.f32 %v535_v29, 0.0 }
 0x124   :  { %v780_v32 = vpack.c.bf16 %v561_v28, %v560_v27 }
 0x125   :  { %v527_v34 = vadd.f32 %v881_v60, %v430_v30  ;;  %v775_v35 = vpack.c.bf16 %v559_v33, %v558_v31  ;;  %v556_v55 = vmax.f32 %v524_v3, 0.0 }
 0x126   :  { %788 = vst [vmem:[#allocation2 + $0x38] sm:$0xff] %v780_v32  }
 0x127   :  { %v557_v36 = vmax.f32 %v527_v34, 0.0  ;;  %787 = vst [vmem:[#allocation2 + $0x30] sm:$0xff] %v775_v35  }
 0x129   :  { %v770_v37 = vpack.c.bf16 %v557_v36, %v556_v55 }
 0x12b   :  { %786 = vst [vmem:[#allocation2 + $0x28] sm:$0xff] %v770_v37  }
 0x12c   :  { %968 = shalt.err (!%p965_p4)
}
 0x12d   :  { %s969_s20 = scalar_lea.hbm %s1189_s3, 1024 }
 0x12e   :  { %p970_p5 = scmp.ne.s32.totalorder %s1189_s3, %s969_s20  ;;  %p973_p6 = scmp.lt.u32.totalorder %s969_s20, %s1189_s3 }
 0x130   :  { %p975_p7 = pnand %p973_p6, %p970_p5 }
 0x132   :  { %978 = shalt.err (!%p975_p7)
}
 0x133   :  { %s982_s25 = smov 64   ;;  %s983_s26 = smov 4  }
 0x134   :  { %653 = dma.vmem_to_hbm [thread:$0]  %s648_s16, 1024, %s1189_s3, [#allocation3], %s982_s25, %s982_s25, %s983_s26  }
 0x135   :  { %979 = dma.done.wait [#allocation3], 1024  }
 0x136   :  { %980 = vsyncadd [#allocation3], 4294966272 }
 0x137   :  { %657 = vsyncpa [#allocation3], 1 }

</bundles_post_ra>
